<compile_context>
chip_gen: v7x
topology: tpu7x:2x2x1
jax: 0.10.0
libtpu: 0.0.40
codegen_flags: <defaults>
</compile_context>

<pallas_src>
import functools

import jax
import jax.numpy as jnp
from jax.experimental import pallas as pl
from jax.experimental.pallas import tpu as pltpu


MAX_LANES = 1024            # widest lane-dense slab we try (8 vregs of 128 lanes)
TARGET_BLOCK_BYTES = 8 << 20  # ~8 MiB per block: per-step overhead < ~7% even on v7x
VMEM_LIMIT_BYTES = 40 << 20   # 2 in + 2 out buffers of 8 MiB + scratch; < 64 MiB (v7x)


def _scale_kernel(alpha, g_ref, o_ref):
    # Pure streaming: one VPU multiply per vreg; bound by HBM bandwidth.
    o_ref[...] = g_ref[...] * jnp.asarray(alpha, g_ref.dtype)


def _pick_lane_width(n: int) -> int:
    """Largest multiple of 128 (<= MAX_LANES) dividing n, or 0 if none."""
    for w in range(MAX_LANES, 0, -128):
        if n % w == 0:
            return w
    return 0


def _scale_by_alpha(g, alpha):
    """alpha * g via a lane-dense Pallas streaming kernel (in-place aliased)."""
    alpha = float(alpha)
    if alpha == 1.0:
        return g                       # compile-time fast path: no HBM pass at all
    if g.size == 0:
        return g
    if alpha == 0.0:
        return jnp.zeros_like(g)       # write-only; skips the read pass

    orig_shape = g.shape
    n = g.size
    w = _pick_lane_width(n)
    if w == 0:
        # Ragged element count: pad+slice around a pallas_call would move ~3x
        # the ideal bytes, so emit one fused XLA elementwise pass instead.
        # TODO(synk): a masked 1-D Pallas tail path could keep this in Pallas.
        return g * jnp.asarray(alpha, g.dtype)

    x2d = g.reshape(-1, w)             # free reshape: n % w == 0
    rows = x2d.shape[0]

    itemsize = jnp.dtype(g.dtype).itemsize
    packing = max(8, 32 // itemsize)   # sublane packing: 8 f32 / 16 bf16 / 32 int8
    rows_per_block = TARGET_BLOCK_BYTES // (w * itemsize)
    rows_per_block = max(packing, (rows_per_block // packing) * packing)

    if rows <= rows_per_block:
        # Single block covering the whole slab (full-dim block shape is legal
        # even when rows % 8 != 0).  No artificial split for small grads.
        tr = rows
    else:
        tr = rows_per_block            # partial edge block is masked: safe elementwise
    grid = (pl.cdiv(rows, tr),)

    out2d = pl.pallas_call(
        functools.partial(_scale_kernel, alpha),
        out_shape=jax.ShapeDtypeStruct(x2d.shape, x2d.dtype),
        grid_spec=pltpu.PrefetchScalarGridSpec(
            num_scalar_prefetch=0,
            grid=grid,
            in_specs=[pl.BlockSpec((tr, w), lambda i: (i, 0))],
            out_specs=pl.BlockSpec((tr, w), lambda i: (i, 0)),
        ),
        input_output_aliases={0: 0},   # overwrite the incoming cotangent buffer
        compiler_params=pltpu.CompilerParams(
            dimension_semantics=("parallel",),
            vmem_limit_bytes=VMEM_LIMIT_BYTES,
        ),
    )(x2d)

    return out2d.reshape(orig_shape)


# alpha is a static Python float (nondiff argnum), matching the PyTorch module
# where alpha is a fixed attribute.  A runtime-scheduled alpha would be passed
# as an SMEM scalar (num_scalar_prefetch=1) to avoid per-value recompiles.
@functools.partial(jax.custom_vjp, nondiff_argnums=(1,))
def scale_grad(x, alpha):
    """Forward: identity (no kernel). Backward: grad * alpha (Pallas kernel)."""
    return x


def _scale_grad_fwd(x, alpha):
    return x, None


def _scale_grad_bwd(alpha, _, g):
    return (_scale_by_alpha(g, alpha),)


scale_grad.defvjp(_scale_grad_fwd, _scale_grad_bwd)


class ScaleGrad:
    """JAX/Pallas equivalent of the PyTorch ScaleGrad module."""

    def __init__(self, alpha: float, training: bool = True):
        self.alpha = alpha
        self.training = training

    def __call__(self, x):
        if not self.training:
            return x  # eval mode: pure pass-through (matches PyTorch)
        return scale_grad(x, self.alpha)


if __name__ == "__main__":
    key = jax.random.PRNGKey(0)
    # Small NCHW-like input consistent with typical usage.
    x = jax.random.normal(key, (2, 4, 16, 16), dtype=jnp.float32)

    mod = ScaleGrad(alpha=0.5, training=True)

    # Forward: identity, no kernel launched.
    y = jax.block_until_ready(mod(x))
    assert y.shape == x.shape and y.dtype == x.dtype
    assert bool(jnp.allclose(y, x)), "forward must be identity"

    # Backward: Pallas scale kernel runs here (grad = 2.0 * alpha).
    def loss(inp):
        return jnp.sum(mod(inp) * 2.0)

    g = jax.block_until_ready(jax.grad(loss)(x))
    assert bool(
        jnp.allclose(g, jnp.full_like(x, 2.0 * mod.alpha))
    ), "grad must be scaled by alpha"

    # Non-1024 lane width path (numel = 384 -> W = 384, no padding).
    x2 = jax.random.normal(jax.random.PRNGKey(1), (3, 128), dtype=jnp.float32)
    g2 = jax.block_until_ready(jax.grad(lambda a: jnp.sum(mod(a) * 3.0))(x2))
    assert bool(jnp.allclose(g2, jnp.full_like(x2, 3.0 * mod.alpha)))

    # bf16 grads (different sublane packing multiple).
    x3 = jax.random.normal(jax.random.PRNGKey(2), (4, 8, 32), dtype=jnp.bfloat16)
    g3 = jax.block_until_ready(
        jax.grad(lambda a: jnp.sum(mod(a).astype(jnp.float32)))(x3)
    )
    assert bool(
        jnp.allclose(g3.astype(jnp.float32),
                     jnp.full((4, 8, 32), mod.alpha, jnp.float32))
    )

    # Ragged element count -> fused jnp fallback (no pad+slice round trip).
    x4 = jax.random.normal(jax.random.PRNGKey(3), (3, 5, 7), dtype=jnp.float32)
    g4 = jax.block_until_ready(jax.grad(lambda a: jnp.sum(mod(a)))(x4))
    assert bool(jnp.allclose(g4, jnp.full_like(x4, mod.alpha)))

    # Multi-block path (grid > 1) with a masked partial edge block:
    # 2*1280*1024 f32 = 10 MiB -> rows=2560, tile=2048 -> grid=(2,).
    x5 = jax.random.normal(jax.random.PRNGKey(4), (2, 1280, 1024), dtype=jnp.float32)
    g5 = jax.block_until_ready(jax.grad(lambda a: jnp.sum(mod(a)))(x5))
    assert bool(jnp.allclose(g5, jnp.full_like(x5, mod.alpha)))

    # Eval mode: pure pass-through (no custom_vjp involved).
    mod_eval = ScaleGrad(alpha=0.5, training=False)
    assert bool(jnp.allclose(mod_eval(x), x))

    print("KERNEL_OK")
</pallas_src>

<mosaic_0001>
module attributes {stable_mosaic.version = 11 : i64} {
  func.func @_scale_kernel(%arg0: i32, %arg1: memref<2x1024xf32, #tpu.memory_space<vmem>>, %arg2: memref<2x1024xf32, #tpu.memory_space<vmem>>) attributes {dimension_semantics = [#tpu.dimension_semantics<parallel>], iteration_bounds = array<i64: 1>, scalar_prefetch = 0 : i64, scratch_operands = 0 : i64, tpu.core_type = #tpu.core_type<tc>, window_params = [{transform_indices = @transform_0, window_bounds = array<i64: 2, 1024>}, {transform_indices = @transform_1, window_bounds = array<i64: 2, 1024>}]} {
    %c0 = arith.constant 0 : index
    %c0_0 = arith.constant 0 : index
    %0 = vector.load %arg1[%c0, %c0_0] : memref<2x1024xf32, #tpu.memory_space<vmem>>, vector<2x1024xf32>
    %cst = arith.constant 5.000000e-01 : f32
    %1 = vector.broadcast %cst : f32 to vector<2x1024xf32>
    %2 = arith.mulf %0, %1 : vector<2x1024xf32>
    %c0_1 = arith.constant 0 : index
    %c0_2 = arith.constant 0 : index
    %3 = vector.load %arg2[%c0_1, %c0_2] : memref<2x1024xf32, #tpu.memory_space<vmem>>, vector<2x1024xf32>
    tpu.vector_store %arg2[%c0_1, %c0_2], %2 {strides = array<i32>} : memref<2x1024xf32, #tpu.memory_space<vmem>>, vector<2x1024xf32>,
    return
  }
  func.func @transform_0(%arg0: i32) -> (i32, i32) {
    %c0_i32 = arith.constant 0 : i32
    %c0_i32_0 = arith.constant 0 : i32
    return %arg0, %c0_i32 : i32, i32
  }
  func.func @transform_1(%arg0: i32) -> (i32, i32) {
    %c0_i32 = arith.constant 0 : i32
    %c0_i32_0 = arith.constant 0 : i32
    return %arg0, %c0_i32 : i32, i32
  }
}

</mosaic_0001>

<bundles_post_ra>
// kernel: tpu_custom_call.1
= control target key start
LH: loop header
LB: loop body
LE: loop exit
PB: predicated region body
PF: predicated region fallthrough
CT: control target
= control target key end

     0   :  { %6 = vsyncpa [#allocation3], 0  ;;  %s128_s0 = inlined_call_operand.hbm [shape: f32[2,1024], index: 0, kind: input, shape index: {}, may-alias: {0,1}]   ;;  %s129_s1 = inlined_call_operand.hbm [shape: f32[2,1024], index: 1, kind: output, shape index: {}, may-alias: {0,1}]  }
   0x1   :  { %7 = vsyncpa [#allocation4], 0  ;;  %s92_s6 = smov [#allocation2]   ;;  %s44_s10 = scalar_lea.hbm %s128_s0, 256 }
   0x2   :  { %s14_s7 = sshll.u32 %s92_s6, 4  ;;  %p45_p0 = scmp.ne.s32.totalorder %s128_s0, %s44_s10  ;;  %s15_s7 = int_to_ptr.vmem [resolvable:$true] %s14_s7 }
   0x3   :  { %p48_p1 = scmp.lt.u32.totalorder %s44_s10, %s128_s0 }
   0x5   :  { %p50_p2 = pnand %p48_p1, %p45_p0 }
   0x7   :  { %53 = shalt.err (!%p50_p2)
}
   0x8   :  { %s54_s15 = scalar_lea.vmem %s15_s7, 256  ;;  %p59_p4 = scmp.lt.s32.totalorder %s15_s7, %s15_s7 }
   0x9   :  { %p55_p3 = scmp.ne.s32.totalorder %s15_s7, %s54_s15  ;;  %p60_p5 = scmp.lt.s32.totalorder %s54_s15, %s54_s15 }
   0xb   :  { %p61_p6 = por %p60_p5, %p59_p4 }
   0xd   :  { %p62_p7 = pnand %p61_p6, %p55_p3 }
   0xf   :  { %65 = shalt.err (!%p62_p7)
}
  0x10   :  { %17 = dma.hbm_to_vmem [thread:$0]  %s128_s0, 256, %s15_s7, [#allocation3]  }
  0x11   :  { %88 = dma.done.wait [#allocation3], 256  }
  0x12   :  { %89 = vsyncadd [#allocation3], 4294967040  ;;  %s93_s18 = smov [#allocation5]   ;;  %v21_v0 = vld [vmem:[#allocation2] sm:$0xff]  ;;  %v22_v1 = vld [vmem:[#allocation2 + $0x8] sm:$0xff] }
  0x13   :  { %s33_s19 = sshll.u32 %s93_s18, 4  ;;  %v23_v2 = vmul.f32 0.5, %v21_v0  ;;  %v24_v3 = vmul.f32 0.5, %v22_v1  ;;  %s34_s19 = int_to_ptr.vmem [resolvable:$true] %s33_s19 }
  0x14   :  { %s66_s20 = scalar_lea.vmem %s34_s19, 256  ;;  %p71_p9 = scmp.lt.s32.totalorder %s34_s19, %s34_s19 }
  0x15   :  { %25 = vst [vmem:[#allocation5] sm:$0xff] %v23_v2  ;;  %26 = vst [vmem:[#allocation5 + $0x8] sm:$0xff] %v24_v3  ;;  %p67_p8 = scmp.ne.s32.totalorder %s34_s19, %s66_s20  ;;  %p72_p10 = scmp.lt.s32.totalorder %s66_s20, %s66_s20 }
  0x17   :  { %p73_p11 = por %p72_p10, %p71_p9 }
  0x19   :  { %p74_p12 = pnand %p73_p11, %p67_p8 }
  0x1b   :  { %77 = shalt.err (!%p74_p12)
}
  0x1c   :  { %s78_s22 = scalar_lea.hbm %s129_s1, 256 }
  0x1d   :  { %p79_p13 = scmp.ne.s32.totalorder %s129_s1, %s78_s22  ;;  %p82_p0 = scmp.lt.u32.totalorder %s78_s22, %s129_s1 }
  0x1f   :  { %p84_p1 = pnand %p82_p0, %p79_p13 }
  0x21   :  { %87 = shalt.err (!%p84_p1)
}
  0x22   :  { %36 = dma.vmem_to_hbm [thread:$0]  %s34_s19, 256, %s129_s1, [#allocation4]  }
  0x23   :  { %90 = dma.done.wait [#allocation4], 256  }
  0x24   :  { %91 = vsyncadd [#allocation4], 4294967040 }
  0x25   :  { %40 = vsyncpa [#allocation3], 1 }
  0x26   :  { %41 = vsyncpa [#allocation4], 1 }

</bundles_post_ra>
